<compile_context>
chip_gen: v7x
topology: tpu7x:2x2x1
jax: 0.10.0
libtpu: 0.0.40
codegen_flags: <defaults>
</compile_context>

<pallas_src>
import functools
import math

import jax
import jax.numpy as jnp
from jax.experimental import pallas as pl
from jax.experimental.pallas import tpu as pltpu


def _round_up(x, m):
    return (x + m - 1) // m * m


def mha_kernel(q_ref, k_ref, v_ref, wq_ref, wk_ref, wv_ref, sel_ref, selt_ref,
               o_ref, *, numheads, block_b, seq_len):
    f32 = jnp.float32
    hdim = o_ref.shape[-1]

    q = q_ref[...]                                            # (TB, Dq)
    k = k_ref[...]                                            # (TB*S, Dk)
    v = v_ref[...]                                            # (TB*S, Dv)

    # --- Projections: large MXU matmuls against pre-transposed weights.
    # 1/sqrt(head_dim) is already folded into wq_ref by the wrapper.
    qp = jnp.dot(q, wq_ref[...], preferred_element_type=f32)  # (TB, hdim)
    kp = jnp.dot(k, wk_ref[...], preferred_element_type=f32)  # (TB*S, hdim)
    vp = jnp.dot(v, wv_ref[...], preferred_element_type=f32)  # (TB*S, hdim)

    kp3 = kp.reshape(block_b, seq_len, hdim)                  # (TB, S, hdim)
    vp3 = vp.reshape(block_b, seq_len, hdim)                  # (TB, S, hdim)

    sel = sel_ref[...]                                        # (hdim, H), f32
    sel_t = selt_ref[...]                                     # (H, hdim), f32

    # --- Scores for all heads at once ---------------------------------------
    # scores[b, s, h] = sum_{d in head h} qp[b, d] * kp[b, s, d]
    prod = kp3 * qp[:, None, :]                               # (TB, S, hdim)
    scores = jnp.dot(prod.reshape(block_b * seq_len, hdim), sel,
                     preferred_element_type=f32)              # (TB*S, H)
    scores = scores.reshape(block_b, seq_len, numheads)       # (TB, S, H)

    # --- Softmax over S (axis=1), all in f32 ---------------------------------
    m = jnp.max(scores, axis=1, keepdims=True)                # (TB, 1, H)
    e = jnp.exp(scores - m)                                   # (TB, S, H)
    denom = jnp.sum(e, axis=1, keepdims=True)                 # (TB, 1, H)
    alphas = e * pl.reciprocal(denom, approx=True)            # (TB, S, H)

    # --- Attention-weighted reduction, lane-dense ----------------------------
    # Broadcast each head's alpha across its dh lanes, then reduce over S.
    alphas_full = jnp.dot(alphas.reshape(block_b * seq_len, numheads), sel_t,
                          preferred_element_type=f32)         # (TB*S, hdim)
    weighted = alphas_full.reshape(block_b, seq_len, hdim) * vp3
    out = jnp.sum(weighted, axis=1)                           # (TB, hdim)

    # Single store of the whole block.
    # TODO(synk): if the consumer accepts a packed (B//4, 4*hdim) layout, a
    # fully 128-lane-dense output store is possible; output bytes are ~6% of
    # traffic here so it is intentionally not done.
    o_ref[...] = out.astype(o_ref.dtype)


def multi_head_attention(query, key, val, wq, wk, wv, *, numheads,
                         block_b=None, block_b_cap=256, vmem_limit_bytes=None):
    B, Dq = query.shape
    _, S, Dk = key.shape
    _, _, Dv = val.shape
    hdim = wq.shape[0]
    assert hdim % numheads == 0
    head_dim = hdim // numheads

    # ---- Batch block selection -------------------------------------------
    # Aim for >= 2 grid steps when B is large (v7x 2-TC sharding of the
    # "parallel" axis) while staying under the VMEM-driven cap.  No padding
    # of key/val is done: the tail block is handled by Pallas partial-block
    # masking (row-independent math; OOB output rows are never written).
    if block_b is None:
        block_b = min(block_b_cap, _round_up(pl.cdiv(B, 2), 8))
    if block_b >= B:
        block_b = B                      # single block, no partial rows
    else:
        block_b = max(8, _round_up(block_b, 8))
    n_blocks = pl.cdiv(B, block_b)

    # Free, contiguous reshapes: kernel consumes (rows, D) blocks directly.
    key2 = key.reshape(B * S, Dk)
    val2 = val.reshape(B * S, Dv)

    # Hoist the weight transposes out of the kernel (pass (Din, hdim)) and
    # fold the softmax scale into the query projection (free).
    scale = 1.0 / math.sqrt(head_dim)
    wq_t = wq.T * jnp.asarray(scale, dtype=wq.dtype)
    wk_t = wk.T
    wv_t = wv.T

    # Head-selector matrices, built once (grid-invariant inputs):
    #   sel[d, h] = 1 if lane d belongs to head h else 0;  sel_t = sel.T
    h_of_d = jnp.arange(hdim, dtype=jnp.int32) // head_dim
    sel = (h_of_d[:, None] ==
           jnp.arange(numheads, dtype=jnp.int32)[None, :]).astype(jnp.float32)
    sel_t = sel.T

    kernel = functools.partial(mha_kernel, numheads=numheads,
                               block_b=block_b, seq_len=S)

    out = pl.pallas_call(
        kernel,
        out_shape=jax.ShapeDtypeStruct((B, hdim), query.dtype),
        grid_spec=pltpu.PrefetchScalarGridSpec(
            num_scalar_prefetch=0,
            grid=(n_blocks,),
            in_specs=[
                pl.BlockSpec((block_b, Dq), lambda b: (b, 0)),
                pl.BlockSpec((block_b * S, Dk), lambda b: (b, 0)),
                pl.BlockSpec((block_b * S, Dv), lambda b: (b, 0)),
                pl.BlockSpec((Dq, hdim), lambda b: (0, 0)),       # grid-invariant
                pl.BlockSpec((Dk, hdim), lambda b: (0, 0)),
                pl.BlockSpec((Dv, hdim), lambda b: (0, 0)),
                pl.BlockSpec((hdim, numheads), lambda b: (0, 0)),
                pl.BlockSpec((numheads, hdim), lambda b: (0, 0)),
            ],
            out_specs=pl.BlockSpec((block_b, hdim), lambda b: (b, 0)),
        ),
        compiler_params=pltpu.CompilerParams(
            dimension_semantics=("parallel",),
            vmem_limit_bytes=vmem_limit_bytes),
    )(query, key2, val2, wq_t, wk_t, wv_t, sel, sel_t)
    return out


def mha_reference(query, key, val, wq, wk, wv, *, numheads):
    """Pure-JAX reference mirroring the PyTorch forward exactly."""
    B, _ = query.shape
    hdim = wq.shape[0]
    dh = hdim // numheads
    queries = query @ wq.T                                   # (B, hdim)
    context = key @ wk.T                                     # (B, S, hdim)
    values = val @ wv.T                                      # (B, S, hdim)
    queries = queries.reshape(B, numheads, dh)               # (B, H, dh)
    context = context.reshape(B, -1, numheads, dh).transpose(0, 2, 1, 3)
    values = values.reshape(B, -1, numheads, dh).transpose(0, 2, 1, 3)
    weights = jnp.einsum('bhd,bhsd->bhs', queries, context) / jnp.sqrt(dh)
    alphas = jax.nn.softmax(weights, axis=-1)
    red = jnp.einsum('bhs,bhsd->bhd', alphas, values)
    return red.reshape(B, -1)


if __name__ == "__main__":
    # Module hyperparameters (small, consistent with the forward).
    B, S = 2, 8
    querydim = keydim = valdim = hdim = 32
    numheads = 2

    key0 = jax.random.PRNGKey(0)
    k_q, k_k, k_v, k_wq, k_wk, k_wv = jax.random.split(key0, 6)

    query = jax.random.normal(k_q, (B, querydim), dtype=jnp.float32)
    keyx = jax.random.normal(k_k, (B, S, keydim), dtype=jnp.float32)
    valx = jax.random.normal(k_v, (B, S, valdim), dtype=jnp.float32)

    # Deterministic "Linear" weights, PyTorch (out_features, in_features) layout.
    wq = jax.random.normal(k_wq, (hdim, querydim), dtype=jnp.float32) * 0.1
    wk = jax.random.normal(k_wk, (hdim, keydim), dtype=jnp.float32) * 0.1
    wv = jax.random.normal(k_wv, (hdim, valdim), dtype=jnp.float32) * 0.1

    out = multi_head_attention(query, keyx, valx, wq, wk, wv, numheads=numheads)
    out = jax.block_until_ready(out)

    ref = mha_reference(query, keyx, valx, wq, wk, wv, numheads=numheads)
    assert out.shape == (B, hdim)
    # Tolerance accounts for the EUP approximate reciprocal in the softmax
    # denominator (relative error ~1e-4); structural errors would be O(1).
    assert jnp.allclose(out, ref, atol=2e-3, rtol=2e-3), "mismatch vs reference"

    # TODO(synk): gumbel-softmax mixing, dropout/attn_dropout and the optional
    # layernorms are training-only / optional paths and are intentionally
    # omitted (eval-mode forward).
    print("KERNEL_OK")
</pallas_src>

<mosaic_0001>
module attributes {stable_mosaic.version = 11 : i64} {
  func.func @mha_kernel(%arg0: i32, %arg1: memref<2x32xf32, #tpu.memory_space<vmem>>, %arg2: memref<16x32xf32, #tpu.memory_space<vmem>>, %arg3: memref<16x32xf32, #tpu.memory_space<vmem>>, %arg4: memref<32x32xf32, #tpu.memory_space<vmem>>, %arg5: memref<32x32xf32, #tpu.memory_space<vmem>>, %arg6: memref<32x32xf32, #tpu.memory_space<vmem>>, %arg7: memref<32x2xf32, #tpu.memory_space<vmem>>, %arg8: memref<2x32xf32, #tpu.memory_space<vmem>>, %arg9: memref<2x32xf32, #tpu.memory_space<vmem>>) attributes {dimension_semantics = [#tpu.dimension_semantics<parallel>], iteration_bounds = array<i64: 1>, scalar_prefetch = 0 : i64, scratch_operands = 0 : i64, tpu.core_type = #tpu.core_type<tc>, window_params = [{transform_indices = @transform_0, window_bounds = array<i64: 2, 32>}, {transform_indices = @transform_1, window_bounds = array<i64: 16, 32>}, {transform_indices = @transform_2, window_bounds = array<i64: 16, 32>}, {pipeline_mode = #tpu.pipeline_mode<synchronous>, transform_indices = @transform_3, window_bounds = array<i64: 32, 32>}, {pipeline_mode = #tpu.pipeline_mode<synchronous>, transform_indices = @transform_4, window_bounds = array<i64: 32, 32>}, {pipeline_mode = #tpu.pipeline_mode<synchronous>, transform_indices = @transform_5, window_bounds = array<i64: 32, 32>}, {pipeline_mode = #tpu.pipeline_mode<synchronous>, transform_indices = @transform_6, window_bounds = array<i64: 32, 2>}, {pipeline_mode = #tpu.pipeline_mode<synchronous>, transform_indices = @transform_7, window_bounds = array<i64: 2, 32>}, {transform_indices = @transform_8, window_bounds = array<i64: 2, 32>}]} {
    %c0 = arith.constant 0 : index
    %c0_0 = arith.constant 0 : index
    %0 = vector.load %arg1[%c0, %c0_0] : memref<2x32xf32, #tpu.memory_space<vmem>>, vector<2x32xf32>
    %c0_1 = arith.constant 0 : index
    %c0_2 = arith.constant 0 : index
    %1 = vector.load %arg2[%c0_1, %c0_2] : memref<16x32xf32, #tpu.memory_space<vmem>>, vector<16x32xf32>
    %c0_3 = arith.constant 0 : index
    %c0_4 = arith.constant 0 : index
    %2 = vector.load %arg3[%c0_3, %c0_4] : memref<16x32xf32, #tpu.memory_space<vmem>>, vector<16x32xf32>
    %c0_5 = arith.constant 0 : index
    %c0_6 = arith.constant 0 : index
    %3 = vector.load %arg4[%c0_5, %c0_6] : memref<32x32xf32, #tpu.memory_space<vmem>>, vector<32x32xf32>
    %cst = arith.constant dense<0.000000e+00> : vector<2x32xf32>
    %4 = tpu.matmul %0, %3, %cst {dimension_numbers = #tpu.dot_dimension_numbers<[1], [0], [0], [1], [0, 0, 1, 1], [], []>} : vector<2x32xf32>, vector<32x32xf32>, vector<2x32xf32> -> vector<2x32xf32>
    %c0_7 = arith.constant 0 : index
    %c0_8 = arith.constant 0 : index
    %5 = vector.load %arg5[%c0_7, %c0_8] : memref<32x32xf32, #tpu.memory_space<vmem>>, vector<32x32xf32>
    %cst_9 = arith.constant dense<0.000000e+00> : vector<16x32xf32>
    %6 = tpu.matmul %1, %5, %cst_9 {dimension_numbers = #tpu.dot_dimension_numbers<[1], [0], [0], [1], [0, 0, 1, 1], [], []>} : vector<16x32xf32>, vector<32x32xf32>, vector<16x32xf32> -> vector<16x32xf32>
    %c0_10 = arith.constant 0 : index
    %c0_11 = arith.constant 0 : index
    %7 = vector.load %arg6[%c0_10, %c0_11] : memref<32x32xf32, #tpu.memory_space<vmem>>, vector<32x32xf32>
    %cst_12 = arith.constant dense<0.000000e+00> : vector<16x32xf32>
    %8 = tpu.matmul %2, %7, %cst_12 {dimension_numbers = #tpu.dot_dimension_numbers<[1], [0], [0], [1], [0, 0, 1, 1], [], []>} : vector<16x32xf32>, vector<32x32xf32>, vector<16x32xf32> -> vector<16x32xf32>
    %9 = vector.shape_cast %6 : vector<16x32xf32> to vector<2x8x32xf32>
    %10 = vector.shape_cast %8 : vector<16x32xf32> to vector<2x8x32xf32>
    %c0_13 = arith.constant 0 : index
    %c0_14 = arith.constant 0 : index
    %11 = vector.load %arg7[%c0_13, %c0_14] : memref<32x2xf32, #tpu.memory_space<vmem>>, vector<32x2xf32>
    %c0_15 = arith.constant 0 : index
    %c0_16 = arith.constant 0 : index
    %12 = vector.load %arg8[%c0_15, %c0_16] : memref<2x32xf32, #tpu.memory_space<vmem>>, vector<2x32xf32>
    %13 = vector.shape_cast %4 : vector<2x32xf32> to vector<2x1x32xf32>
    %14 = vector.broadcast %13 : vector<2x1x32xf32> to vector<2x8x32xf32>
    %15 = arith.mulf %9, %14 : vector<2x8x32xf32>
    %16 = vector.shape_cast %15 : vector<2x8x32xf32> to vector<16x32xf32>
    %cst_17 = arith.constant dense<0.000000e+00> : vector<16x2xf32>
    %17 = tpu.matmul %16, %11, %cst_17 {dimension_numbers = #tpu.dot_dimension_numbers<[1], [0], [0], [1], [0, 0, 1, 1], [], []>} : vector<16x32xf32>, vector<32x2xf32>, vector<16x2xf32> -> vector<16x2xf32>
    %18 = vector.shape_cast %17 : vector<16x2xf32> to vector<2x8x2xf32>
    %cst_18 = arith.constant dense<0xFF800000> : vector<2x2xf32>
    %19 = vector.multi_reduction <maximumf>, %18, %cst_18 [1] : vector<2x8x2xf32> to vector<2x2xf32>
    %20 = vector.shape_cast %19 : vector<2x2xf32> to vector<2x1x2xf32>
    %21 = vector.broadcast %20 : vector<2x1x2xf32> to vector<2x8x2xf32>
    %22 = arith.subf %18, %21 : vector<2x8x2xf32>
    %23 = math.exp %22 : vector<2x8x2xf32>
    %cst_19 = arith.constant dense<0.000000e+00> : vector<2x2xf32>
    %24 = vector.multi_reduction <add>, %23, %cst_19 [1] : vector<2x8x2xf32> to vector<2x2xf32>
    %25 = vector.shape_cast %24 : vector<2x2xf32> to vector<2x1x2xf32>
    %26 = tpu.reciprocal %25 {approx = true} : vector<2x1x2xf32> -> vector<2x1x2xf32>
    %27 = vector.broadcast %26 : vector<2x1x2xf32> to vector<2x8x2xf32>
    %28 = arith.mulf %23, %27 : vector<2x8x2xf32>
    %29 = vector.shape_cast %28 : vector<2x8x2xf32> to vector<16x2xf32>
    %cst_20 = arith.constant dense<0.000000e+00> : vector<16x32xf32>
    %30 = tpu.matmul %29, %12, %cst_20 {dimension_numbers = #tpu.dot_dimension_numbers<[1], [0], [0], [1], [0, 0, 1, 1], [], []>} : vector<16x2xf32>, vector<2x32xf32>, vector<16x32xf32> -> vector<16x32xf32>
    %31 = vector.shape_cast %30 : vector<16x32xf32> to vector<2x8x32xf32>
    %32 = arith.mulf %31, %10 : vector<2x8x32xf32>
    %cst_21 = arith.constant dense<0.000000e+00> : vector<2x32xf32>
    %33 = vector.multi_reduction <add>, %32, %cst_21 [1] : vector<2x8x32xf32> to vector<2x32xf32>
    %c0_22 = arith.constant 0 : index
    %c0_23 = arith.constant 0 : index
    %34 = vector.load %arg9[%c0_22, %c0_23] : memref<2x32xf32, #tpu.memory_space<vmem>>, vector<2x32xf32>
    tpu.vector_store %arg9[%c0_22, %c0_23], %33 {strides = array<i32>} : memref<2x32xf32, #tpu.memory_space<vmem>>, vector<2x32xf32>,
    return
  }
  func.func @transform_0(%arg0: i32) -> (i32, i32) {
    %c0_i32 = arith.constant 0 : i32
    %c0_i32_0 = arith.constant 0 : i32
    return %arg0, %c0_i32 : i32, i32
  }
  func.func @transform_1(%arg0: i32) -> (i32, i32) {
    %c0_i32 = arith.constant 0 : i32
    %c0_i32_0 = arith.constant 0 : i32
    return %arg0, %c0_i32 : i32, i32
  }
  func.func @transform_2(%arg0: i32) -> (i32, i32) {
    %c0_i32 = arith.constant 0 : i32
    %c0_i32_0 = arith.constant 0 : i32
    return %arg0, %c0_i32 : i32, i32
  }
  func.func @transform_3(%arg0: i32) -> (i32, i32) {
    %c0_i32 = arith.constant 0 : i32
    %c0_i32_0 = arith.constant 0 : i32
    %c0_i32_1 = arith.constant 0 : i32
    return %c0_i32, %c0_i32_0 : i32, i32
  }
  func.func @transform_4(%arg0: i32) -> (i32, i32) {
    %c0_i32 = arith.constant 0 : i32
    %c0_i32_0 = arith.constant 0 : i32
    %c0_i32_1 = arith.constant 0 : i32
    return %c0_i32, %c0_i32_0 : i32, i32
  }
  func.func @transform_5(%arg0: i32) -> (i32, i32) {
    %c0_i32 = arith.constant 0 : i32
    %c0_i32_0 = arith.constant 0 : i32
    %c0_i32_1 = arith.constant 0 : i32
    return %c0_i32, %c0_i32_0 : i32, i32
  }
  func.func @transform_6(%arg0: i32) -> (i32, i32) {
    %c0_i32 = arith.constant 0 : i32
    %c0_i32_0 = arith.constant 0 : i32
    %c0_i32_1 = arith.constant 0 : i32
    return %c0_i32, %c0_i32_0 : i32, i32
  }
  func.func @transform_7(%arg0: i32) -> (i32, i32) {
    %c0_i32 = arith.constant 0 : i32
    %c0_i32_0 = arith.constant 0 : i32
    %c0_i32_1 = arith.constant 0 : i32
    return %c0_i32, %c0_i32_0 : i32, i32
  }
  func.func @transform_8(%arg0: i32) -> (i32, i32) {
    %c0_i32 = arith.constant 0 : i32
    %c0_i32_0 = arith.constant 0 : i32
    return %arg0, %c0_i32 : i32, i32
  }
}

</mosaic_0001>

<bundles_post_ra>
// kernel: tpu_custom_call.1
= control target key start
LH: loop header
LB: loop body
LE: loop exit
PB: predicated region body
PF: predicated region fallthrough
CT: control target
= control target key end

     0   :  { %13 = vsyncpa [#allocation3], 0  ;;  %s1062_s0 = inlined_call_operand.vmem [shape: f32[2,32], index: 0, kind: input, shape index: {}]   ;;  %s1063_s1 = inlined_call_operand.hbm [shape: f32[16,32], index: 1, kind: input, shape index: {}]   ;;  %s1064_s2 = inlined_call_operand.hbm [shape: f32[16,32], index: 2, kind: input, shape index: {}]   ;;  %s1065_s3 = inlined_call_operand.vmem [shape: f32[32,32], index: 3, kind: input, shape index: {}]   ;;  %s1066_s4 = inlined_call_operand.hbm [shape: f32[32,32], index: 4, kind: input, shape index: {}]   ;;  %s1067_s5 = inlined_call_operand.hbm [shape: f32[32,32], index: 5, kind: input, shape index: {}]   ;;  %s1068_s6 = inlined_call_operand.vmem [shape: f32[32,2], index: 6, kind: input, shape index: {}]   ;;  %s1069_s7 = inlined_call_operand.vmem [shape: f32[2,32], index: 7, kind: input, shape index: {}]   ;;  %s1070_s8 = inlined_call_operand.hbm [shape: f32[2,32], index: 8, kind: output, shape index: {}]  }
   0x1   :  { %14 = vsyncpa [#allocation6], 0 }
   0x2   :  { %15 = vsyncpa [#allocation9], 0 }
   0x3   :  { %16 = vsyncpa [#allocation4], 0  ;;  %s875_s27 = smov [#allocation5]   ;;  %s876_s29 = smov [#allocation2]  }
   0x4   :  { %s36_s28 = sshll.u32 %s875_s27, 4  ;;  %s24_s30 = sshll.u32 %s876_s29, 4  ;;  %s37_s28 = int_to_ptr.vmem [resolvable:$true] %s36_s28  ;;  %s931_s30 = int_to_ptr.vmem [resolvable:$true] %s24_s30 }
   0x5   :  { %s757_s11 = scalar_lea.hbm %s1064_s2, 256 }
   0x6   :  { %p758_p0 = scmp.ne.s32.totalorder %s1064_s2, %s757_s11  ;;  %p761_p1 = scmp.lt.u32.totalorder %s757_s11, %s1064_s2 }
   0x8   :  { %p763_p2 = pnand %p761_p1, %p758_p0 }
   0xa   :  { %766 = shalt.err (!%p763_p2)
}
   0xb   :  { %s767_s16 = scalar_lea.vmem %s37_s28, 256  ;;  %p772_p4 = scmp.lt.s32.totalorder %s37_s28, %s37_s28 }
   0xc   :  { %p768_p3 = scmp.ne.s32.totalorder %s37_s28, %s767_s16  ;;  %p773_p5 = scmp.lt.s32.totalorder %s767_s16, %s767_s16 }
   0xe   :  { %p774_p6 = por %p773_p5, %p772_p4 }
  0x10   :  { %p775_p7 = pnand %p774_p6, %p768_p3 }
  0x12   :  { %778 = shalt.err (!%p775_p7)
}
  0x13   :  { %s877_s17 = smov 128   ;;  %s878_s18 = smov 8  }
  0x14   :  { %42 = dma.hbm_to_vmem [thread:$0]  %s1064_s2, 256, %s37_s28, [#allocation6], %s877_s17, %s877_s17, %s878_s18  }
  0x15   :  { %s779_s23 = scalar_lea.hbm %s1063_s1, 256 }
  0x16   :  { %p780_p8 = scmp.ne.s32.totalorder %s1063_s1, %s779_s23  ;;  %p783_p9 = scmp.lt.u32.totalorder %s779_s23, %s1063_s1 }
  0x18   :  { %p785_p10 = pnand %p783_p9, %p780_p8 }
  0x1a   :  { %788 = shalt.err (!%p785_p10)
}
  0x1b   :  { %s789_s29 = scalar_lea.vmem %s931_s30, 256  ;;  %p794_p12 = scmp.lt.s32.totalorder %s931_s30, %s931_s30 }
  0x1c   :  { %p790_p11 = scmp.ne.s32.totalorder %s931_s30, %s789_s29  ;;  %p795_p13 = scmp.lt.s32.totalorder %s789_s29, %s789_s29 }
  0x1e   :  { %p796_p0 = por %p795_p13, %p794_p12 }
  0x20   :  { %p797_p1 = pnand %p796_p0, %p790_p11 }
  0x22   :  { %800 = shalt.err (!%p797_p1)
}
  0x23   :  { %30 = dma.hbm_to_vmem [thread:$0]  %s1063_s1, 256, %s931_s30, [#allocation3], %s877_s17, %s877_s17, %s878_s18  }
  0x24   :  { %s879_s9 = smov [#allocation7]   ;;  %s880_s11 = smov [#allocation8]  }
  0x25   :  { %s50_s10 = sshll.u32 %s879_s9, 4  ;;  %s62_s12 = sshll.u32 %s880_s11, 4  ;;  %s51_s10 = int_to_ptr.vmem [resolvable:$true] %s50_s10  ;;  %s968_s12 = int_to_ptr.vmem [resolvable:$true] %s62_s12 }
  0x26   :  { %s801_s15 = scalar_lea.hbm %s1066_s4, 512 }
  0x27   :  { %p802_p2 = scmp.ne.s32.totalorder %s1066_s4, %s801_s15  ;;  %p805_p3 = scmp.lt.u32.totalorder %s801_s15, %s1066_s4 }
  0x29   :  { %p807_p4 = pnand %p805_p3, %p802_p2 }
  0x2b   :  { %810 = shalt.err (!%p807_p4)
}
  0x2c   :  { %s811_s1 = scalar_lea.vmem %s51_s10, 512  ;;  %p816_p6 = scmp.lt.s32.totalorder %s51_s10, %s51_s10 }
  0x2d   :  { %p812_p5 = scmp.ne.s32.totalorder %s51_s10, %s811_s1  ;;  %p817_p7 = scmp.lt.s32.totalorder %s811_s1, %s811_s1 }
  0x2f   :  { %p818_p8 = por %p817_p7, %p816_p6 }
  0x31   :  { %p819_p9 = pnand %p818_p8, %p812_p5 }
  0x33   :  { %822 = shalt.err (!%p819_p9)
}
  0x34   :  { %56 = dma.hbm_to_vmem [thread:$0]  %s1066_s4, 512, %s51_s10, [#allocation6], %s877_s17, %s877_s17, %s878_s18  }
  0x35   :  { %s823_s25 = scalar_lea.hbm %s1067_s5, 512 }
  0x36   :  { %p824_p10 = scmp.ne.s32.totalorder %s1067_s5, %s823_s25  ;;  %p827_p11 = scmp.lt.u32.totalorder %s823_s25, %s1067_s5 }
  0x38   :  { %p829_p12 = pnand %p827_p11, %p824_p10 }
  0x3a   :  { %832 = shalt.err (!%p829_p12)
}
  0x3b   :  { %s833_s28 = scalar_lea.vmem %s968_s12, 512  ;;  %p838_p0 = scmp.lt.s32.totalorder %s968_s12, %s968_s12 }
  0x3c   :  { %p834_p13 = scmp.ne.s32.totalorder %s968_s12, %s833_s28  ;;  %p839_p1 = scmp.lt.s32.totalorder %s833_s28, %s833_s28 }
  0x3e   :  { %p840_p2 = por %p839_p1, %p838_p0 }
  0x40   :  { %p841_p3 = pnand %p840_p2, %p834_p13 }
  0x42   :  { %844 = shalt.err (!%p841_p3)
}
  0x43   :  { %68 = dma.hbm_to_vmem [thread:$0]  %s1067_s5, 512, %s968_s12, [#allocation9], %s877_s17, %s877_s17, %s878_s18  }
  0x44   :  { %867 = dma.done.wait [#allocation3], 256  }
  0x45   :  { %868 = vsyncadd [#allocation3], 4294967040 }
  0x46   :  { %869 = dma.done.wait [#allocation6], 768  }
  0x47   :  { %870 = vsyncadd [#allocation6], 4294966528 }
  0x48   :  { %871 = dma.done.wait [#allocation9], 512  }
  0x49   :  { %872 = vsyncadd [#allocation9], 4294966784  ;;  %v881_v0 = vmov 0.0|0.0   ;;  %vm882_vm0 = vmmov 0   ;;  %v883_v1 = vmov 0.0   ;;  %v90_v2 = vld [vmem:[%s1065_s3] sm:$0xff]  ;;  %v347_v25 = vlaneseq }
  0x4a   :  { %708 = vmatprep.subr.bf16.mxu0 %v881_v0  ;;  %667 = vmatprep.mubr.msk.f32.mxu0 %vm882_vm0, %v883_v1  ;;  %v91_v3 = vld [vmem:[%s1065_s3 + $0x8] sm:$0xff]  ;;  %v92_v4 = vld [vmem:[%s1065_s3 + $0x10] sm:$0xff]  ;;  %v93_v6 = vld [vmem:[%s1065_s3 + $0x18] sm:$0xff]  ;;  %vm94_vm1 = vcmask 261120   ;;  %v884_v23 = vmov 1966171168  }
  0x4b   :  { %v709_v5 = vpack.c.bf16 %v91_v3, %v90_v2  ;;  %v168_v7 = vld [vmem:[#allocation7] sm:$0xff]  ;;  %v169_v8 = vld [vmem:[#allocation7 + $0x8] sm:$0xff]  ;;  %v170_v10 = vld [vmem:[#allocation7 + $0x10] sm:$0xff]  ;;  %v712_v12 = vpack.c.bf16 %v93_v6, %v92_v4  ;;  %v345_v24 = vunpack.c.l.s4 %v884_v23  ;;  %v348_v27 = vshrl.u32 %v347_v25, 7 }
  0x4c   :  { %v714_v9 = vpack.c.bf16 %v169_v8, %v168_v7  ;;  %v171_v11 = vld [vmem:[#allocation7 + $0x18] sm:$0xff]  ;;  %v86_v14 = vld [vmem:[#allocation2] sm:$0xff]  ;;  %v87_v16 = vld [vmem:[#allocation2 + $0x8] sm:$0xff]  ;;  %vm504_vm2 = vcmask 1041408   ;;  %vm459_vm3 = vcmask 15360   ;;  %vm601_vm4 = vcmask 1041409  }
  0x4d   :  { %710 = vmatpush3.bf16.msra.mxu0 %v709_v5  ;;  %v718_v13 = vpack.c.bf16 %v171_v11, %v170_v10  ;;  %678 = vmatprep.mubr.msk.f32.mxu1 %vm94_vm1, %v86_v14  ;;  %v85_v15 = vld [vmem:[%s1062_s0] sm:$0x3]  ;;  %v339_v18 = vld [vmem:[%s1068_s6 + $0x8] sm:$0xff]  ;;  %v340_v20 = vld [vmem:[%s1068_s6 + $0x10] sm:$0xff]  ;;  %v346_v26 = vunpack.c.0.s8 %v345_v24  ;;  %v368_v32 = vsub.s32 0, %v348_v27  ;;  %vm604_vm5 = vcmask 254976  }
  0x4e   :  { %711 = vmatprep.subr.bf16.mxu0 %v881_v0  ;;  %715 = vmatprep.subr.bf16.mxu1 %v714_v9  ;;  %v338_v17 = vld [vmem:[%s1068_s6] sm:$0xff]  ;;  %v341_v21 = vld [vmem:[%s1068_s6 + $0x18] sm:$0xff]  ;;  %v254_v43 = vld [vmem:[#allocation8 + $0x8] sm:$0xff] }
  0x4f   :  { %717 = vmatpush3.bf16.msra.mxu1 %v714_v9  ;;  %v730_v19 = vpack.c.bf16 %v339_v18, %v338_v17  ;;  %v734_v22 = vpack.c.bf16 %v341_v21, %v340_v20  ;;  %v349_v28 = vsub.s32 %v346_v26, %v348_v27  ;;  %v253_v42 = vld [vmem:[#allocation8] sm:$0xff]  ;;  %v255_v45 = vld [vmem:[#allocation8 + $0x10] sm:$0xff]  ;;  %v256_v46 = vld [vmem:[#allocation8 + $0x18] sm:$0xff] }
  0x50   :  { %719 = vmatprep.subr.bf16.mxu1 %v718_v13  ;;  %v722_v44 = vpack.c.bf16 %v254_v43, %v253_v42  ;;  %v88_v47 = vld [vmem:[#allocation5] sm:$0xff]  ;;  %v726_v48 = vpack.c.bf16 %v256_v46, %v255_v45  ;;  %v342_v49 = vld [vmem:[%s1069_s7] sm:$0x3]  ;;  %v89_v50 = vld [vmem:[#allocation5 + $0x8] sm:$0xff]  ;;  %s885_s7 = smov [#allocation10]  }
  0x51   :  { %713 = vmatpush3.bf16.msra.mxu0 %v712_v12  ;;  %s612_s24 = sshll.u32 %s885_s7, 4  ;;  %s613_s24 = int_to_ptr.vmem [resolvable:$true] %s612_s24 }
  0x52   :  { %723 = vmatprep.subr.bf16.mxu0 %v722_v44  ;;  %s845_s25 = scalar_lea.vmem %s613_s24, 32  ;;  %p850_p5 = scmp.lt.s32.totalorder %s613_s24, %s613_s24 }
  0x53   :  { %721 = vmatpush3.bf16.msra.mxu1 %v718_v13  ;;  %p846_p4 = scmp.ne.s32.totalorder %s613_s24, %s845_s25  ;;  %p851_p6 = scmp.lt.s32.totalorder %s845_s25, %s845_s25 }
  0x54   :  { %668 = vmatmul.mubr.msk.f32.vlgmr.msra.gmra.mrb[0].mxu0 %vm94_vm1, %v85_v15  ;;  %731 = vmatprep.subr.bf16.mxu1 %v730_v19 }
  0x55   :  { %689 = vmatprep.mubr.msk.f32.mxu0 %vm94_vm1, %v88_v47  ;;  %725 = vmatpush3.bf16.msra.mxu0 %v722_v44  ;;  %p852_p7 = por %p851_p6, %p850_p5 }
  0x56   :  { %679 = vmatmul.mubr.msk.f32.vlgmr.msra.gmra.mrb[0].mxu1 %vm94_vm1, %v87_v16  ;;  %727 = vmatprep.subr.bf16.mxu0 %v726_v48 }
  0x57   :  { %733 = vmatpush3.bf16.msra.mxu1 %v730_v19  ;;  %p853_p8 = pnand %p852_p7, %p846_p4 }
  0x58   :  { %735 = vmatprep.subr.bf16.mxu1 %v734_v22 }
  0x59   :  { %729 = vmatpush3.bf16.msra.mxu0 %v726_v48 }
  0x5a   :  { %703 = vmatprep.subr.msk.mxu0 %vm504_vm2, %v342_v49 }
  0x5b   :  { %737 = vmatpush3.bf16.msra.mxu1 %v734_v22 }
  0x5c   :  { %690 = vmatmul.mubr.msk.f32.vlgmr.msra.gmra.mrb[2].mxu0 %vm94_vm1, %v89_v50 }
  0x5d   :  { %704 = vmatpush3.msk.msra.mxu0 %vm504_vm2, %v342_v49 }
 0x127   :  { %v164_v29 = vpop.f32.mrb[0].mxu0 }
 0x128   :  { %v350_v30 = vrot.slane %v164_v29, %v349_v28  ;;  %v669_v31 = vpop.f32.mrb[1].mxu0 }
 0x129   :  { %v680_v33 = vpop.f32.mrb[0].mxu1 }
 0x12a   :  { %v351_v34 = vcombine.high %v350_v30, %v350_v30  ;;  %v358_v35 = vrot.slane %v350_v30, %v349_v28  ;;  %v244_v36 = vpop.f32.mrb[1].mxu1 }
 0x12c   :  { %v365_v37 = vrot.slane %v351_v34, %v349_v28  ;;  %v369_v38 = vrot.slane %v358_v35, %v368_v32 }
 0x12e   :  { %v373_v39 = vrot.slane %v365_v37, %v368_v32  ;;  %v376_v40 = vmul.f32 %v369_v38, %v244_v36 }
 0x12f   :  { %v691_v27 = vpop.f32.mrb[2].mxu0 }
 0x130   :  { %v377_v41 = vmul.f32 %v680_v33, %v373_v39  ;;  %700 = vmatprep.mubr.msk.f32.mxu1 %vm94_vm1, %v376_v40  ;;  %v329_v28 = vpop.f32.mrb[3].mxu0 }
 0x132   :  { %701 = vmatmul.mubr.msk.f32.vlgmr.msra.gmra.mrb[2].mxu1 %vm94_vm1, %v377_v41 }
 0x205   :  { %v702_v51 = vpop.f32.mrb[2].mxu1 }
 0x206   :  { %v467_v52 = vsel %vm459_vm3, %v702_v51, -inf  ;;  %v450_v53 = vpop.f32.mrb[3].mxu1 }
 0x207   :  { %v468_v54 = vrot.slane %v467_v52, 4  ;;  %v460_v55 = vsel %vm459_vm3, %v450_v53, -inf }
 0x208   :  { %v461_v56 = vrot.slane %v460_v55, 4 }
 0x209   :  { %v469_v57 = vmax.f32 %v467_v52, %v468_v54 }
 0x20a   :  { %v462_v58 = vmax.f32 %v460_v55, %v461_v56 }
 0x20b   :  { %v470_v59 = vrot.slane %v469_v57, 2 }
 0x20c   :  { %v463_v60 = vrot.slane %v462_v58, 2 }
 0x20d   :  { %v471_v61 = vmax.f32 %v469_v57, %v470_v59 }
 0x20e   :  { %v464_v62 = vmax.f32 %v462_v58, %v463_v60 }
 0x20f   :  { %v472_v63 = vrot.slane %v471_v61, 1 }
 0x210   :  { %v465_v0 = vrot.slane %v464_v62, 1 }
 0x211   :  { %v473_v1 = vmax.f32 %v471_v61, %v472_v63 }
 0x212   :  { %v466_v2 = vmax.f32 %v464_v62, %v465_v0 }
 0x213   :  { %v475_v3 = vsub.f32 %v702_v51, %v473_v1 }
 0x214   :  { %v474_v4 = vsub.f32 %v450_v53, %v466_v2 }
 0x215   :  { %v478_v5 = vmul.f32 1.442695, %v475_v3 }
 0x216   :  { %v476_v6 = vmul.f32 1.442695, %v474_v4 }
 0x217   :  { %749 = vpow2.f32 %v478_v5 }
 0x218   :  { %751 = vpow2.f32 %v476_v6 }
 0x221   :  { %v750_v7 = vpop.eup %749 }
 0x222   :  { %v752_v8 = vpop.eup %751  ;;  %v487_v9 = vsel %vm459_vm3, %v750_v7, 0.0 }
 0x223   :  { %v488_v10 = vrot.slane %v487_v9, 4  ;;  %v480_v11 = vsel %vm459_vm3, %v752_v8, 0.0 }
 0x224   :  { %v481_v12 = vrot.slane %v480_v11, 4 }
 0x225   :  { %v489_v13 = vadd.f32 %v488_v10, %v487_v9 }
 0x226   :  { %v482_v14 = vadd.f32 %v481_v12, %v480_v11 }
 0x227   :  { %v490_v15 = vrot.slane %v489_v13, 2 }
 0x228   :  { %v483_v16 = vrot.slane %v482_v14, 2 }
 0x229   :  { %v491_v17 = vadd.f32 %v490_v15, %v489_v13 }
 0x22a   :  { %v484_v18 = vadd.f32 %v483_v16, %v482_v14 }
 0x22b   :  { %v492_v19 = vrot.slane %v491_v17, 1 }
 0x22c   :  { %v485_v20 = vrot.slane %v484_v18, 1 }
 0x22d   :  { %v493_v21 = vadd.f32 %v492_v19, %v491_v17 }
 0x22e   :  { %v486_v22 = vadd.f32 %v485_v20, %v484_v18 }
 0x22f   :  { %753 = vrcp.f32 %v493_v21 }
 0x230   :  { %755 = vrcp.f32 %v486_v22 }
 0x239   :  { %v754_v23 = vpop.eup %753 }
 0x23a   :  { %v756_v24 = vpop.eup %755  ;;  %v497_v26 = vmul.f32 %v754_v23, %v750_v7 }
 0x23b   :  { %v496_v25 = vmul.f32 %v756_v24, %v752_v8 }
 0x23d   :  { %705 = vmatprep.mubr.msk.f32.mxu0 %vm459_vm3, %v496_v25 }
 0x23e   :  { %706 = vmatmul.mubr.msk.f32.vlgmr.msra.gmra.mrb[4].mxu0 %vm459_vm3, %v497_v26 }
 0x311   :  { %v707_v29 = vpop.f32.mrb[4].mxu0 }
 0x312   :  { %v584_v30 = vmul.f32 %v707_v29, %v691_v27  ;;  %v574_v31 = vpop.f32.mrb[5].mxu0 }
 0x313   :  { %v583_v32 = vmul.f32 %v574_v31, %v329_v28 }
 0x314   :  { %v592_v33 = vsel %vm94_vm1, %v584_v30, 0.0 }
 0x315   :  { %v593_v34 = vrot.slane %v592_v33, 4  ;;  %v585_v35 = vsel %vm94_vm1, %v583_v32, 0.0 }
 0x316   :  { %v586_v36 = vrot.slane %v585_v35, 4 }
 0x317   :  { %v594_v37 = vadd.f32 %v593_v34, %v592_v33 }
 0x318   :  { %v587_v38 = vadd.f32 %v586_v36, %v585_v35 }
 0x319   :  { %v595_v39 = vrot.slane %v594_v37, 2 }
 0x31a   :  { %v588_v40 = vrot.slane %v587_v38, 2 }
 0x31b   :  { %v596_v41 = vadd.f32 %v595_v39, %v594_v37 }
 0x31c   :  { %v589_v42 = vadd.f32 %v588_v40, %v587_v38 }
 0x31d   :  { %v597_v43 = vrot.slane %v596_v41, 1 }
 0x31e   :  { %v590_v44 = vrot.slane %v589_v42, 1 }
 0x31f   :  { %v598_v45 = vadd.f32 %v597_v43, %v596_v41 }
 0x320   :  { %v591_v46 = vadd.f32 %v590_v44, %v589_v42 }
 0x322   :  { %v602_v47 = vsel %vm601_vm4, %v598_v45, %v591_v46 }
 0x323   :  { %605 = vst.msk [vmem:[#allocation10] sm:$0x3] %vm604_vm5, %v602_v47 }
 0x324   :  { %856 = shalt.err (!%p853_p8)
}
 0x325   :  { %s857_s29 = scalar_lea.hbm %s1070_s8, 32 }
 0x326   :  { %p858_p9 = scmp.ne.s32.totalorder %s1070_s8, %s857_s29  ;;  %p861_p10 = scmp.lt.u32.totalorder %s857_s29, %s1070_s8 }
 0x328   :  { %p863_p11 = pnand %p861_p10, %p858_p9 }
 0x32a   :  { %866 = shalt.err (!%p863_p11)
}
 0x32b   :  { %615 = dma.vmem_to_hbm [thread:$0]  %s613_s24, 32, %s1070_s8, [#allocation4]  }
 0x32c   :  { %873 = dma.done.wait [#allocation4], 32  }
 0x32d   :  { %874 = vsyncadd [#allocation4], 4294967264 }
 0x32e   :  { %619 = vsyncpa [#allocation3], 1 }
 0x32f   :  { %620 = vsyncpa [#allocation6], 1 }
 0x330   :  { %621 = vsyncpa [#allocation9], 1 }
 0x331   :  { %622 = vsyncpa [#allocation4], 1 }

</bundles_post_ra>
